<compile_context>
chip_gen: v5e
topology: v5e:2x2
jax: 0.10.0
libtpu: 0.0.40
codegen_flags: <defaults>
</compile_context>

<pallas_src>
import jax
import jax.numpy as jnp
from jax.experimental import pallas as pl
from jax.experimental.pallas import tpu as pltpu

ITERATION_ROUND = 2


def _round_up(x, m):
    return (x + m - 1) // m * m


# -----------------------------------------------------------------------------
# Kernel A: node_features = fea @ W_lin   and   u^1 = tanh(node_features)
# (u^0 = 0 makes the first message-passing round's matmuls dead work.)
# -----------------------------------------------------------------------------
def _init_kernel(fea_ref, w_lin_ref, nf_ref, u_ref):
    nf = jnp.dot(fea_ref[...], w_lin_ref[...], preferred_element_type=jnp.float32)
    nf_ref[...] = nf
    u_ref[...] = jnp.tanh(nf)


# -----------------------------------------------------------------------------
# Kernel B: one message-passing round
#   m = A @ u_prev      (accumulated over src tiles in f32 VMEM scratch)
#   u = tanh(node_features + relu(m @ Wd0) @ Wd1)   (epilogue at last src tile)
# grid = (dst_tiles, src_tiles); src is the trailing "arbitrary" reduction axis.
# -----------------------------------------------------------------------------
def _round_kernel(adj_ref, u_ref, nf_ref, w_d0_ref, w_d1_ref, out_ref, m_acc):
    k = pl.program_id(1)

    @pl.when(k == 0)
    def _():
        m_acc[...] = jnp.zeros_like(m_acc)

    # bf16 x bf16 -> f32 accumulate on the MXU; adjacency (0/1) is exact in bf16.
    m_acc[...] += jnp.dot(
        adj_ref[...],                              # (T, T) bf16
        u_ref[...].astype(jnp.bfloat16),           # (T, D) bf16 operand
        preferred_element_type=jnp.float32,
    )

    @pl.when(k == pl.num_programs(1) - 1)
    def _():
        m = m_acc[...].astype(jnp.bfloat16)
        h = jnp.dot(m, w_d0_ref[...], preferred_element_type=jnp.float32)
        h = jnp.maximum(h, 0.0).astype(jnp.bfloat16)
        h = jnp.dot(h, w_d1_ref[...], preferred_element_type=jnp.float32)
        out_ref[...] = jnp.tanh(nf_ref[...] + h)


def structure2vec_forward(fea, adj, w_lin, w_dense0, w_dense1,
                          iteration_round=ITERATION_ROUND):
    """Structure2vec forward.

    fea:      (N, in_dim)       node features
    adj:      (N, N)            dense adjacency, adj[dst, src] = 1.0 for edge src->dst
    w_lin:    (out_dim, in_dim) PyTorch nn.Linear weight layout
    w_dense*: (out_dim, out_dim)
    returns:  (N, out_dim)
    """
    if iteration_round == 0:
        # Match the original module: k == 0 returns the raw input features.
        return fea

    n, in_dim = fea.shape
    out_dim = w_lin.shape[0]

    f32, bf16 = jnp.float32, jnp.bfloat16

    # Lane-dense padded feature width and dst/src tile size.
    d_pad = _round_up(max(out_dim, 128), 128)
    tile = min(256, _round_up(n, 8))
    n_pad = _round_up(n, tile)
    n_tiles = n_pad // tile

    # Weights presented as (in_features, out_features), zero-padded to the
    # lane-dense width (exact: padded rows/cols contribute 0, tanh(0) = 0).
    w_lin_t = jnp.zeros((in_dim, d_pad), f32).at[:, :out_dim].set(
        jnp.transpose(w_lin).astype(f32))
    w_d0_t = jnp.zeros((d_pad, d_pad), bf16).at[:out_dim, :out_dim].set(
        jnp.transpose(w_dense0).astype(bf16))
    w_d1_t = jnp.zeros((d_pad, d_pad), bf16).at[:out_dim, :out_dim].set(
        jnp.transpose(w_dense1).astype(bf16))

    # Zero-pad nodes to a multiple of the tile size (padded src rows of adj are
    # zero, so they contribute nothing; padded dst rows are sliced off below).
    fea_p = jnp.zeros((n_pad, in_dim), f32).at[:n].set(fea.astype(f32))
    adj_b = jnp.zeros((n_pad, n_pad), bf16).at[:n, :n].set(adj.astype(bf16))

    # --- round 1 (free): u^1 = tanh(node_features) ---------------------------
    nf, u = pl.pallas_call(
        _init_kernel,
        out_shape=(
            jax.ShapeDtypeStruct((n_pad, d_pad), f32),
            jax.ShapeDtypeStruct((n_pad, d_pad), f32),
        ),
        grid=(n_tiles,),
        in_specs=[
            pl.BlockSpec((tile, in_dim), lambda i: (i, 0)),
            pl.BlockSpec((in_dim, d_pad), lambda i: (0, 0)),
        ],
        out_specs=(
            pl.BlockSpec((tile, d_pad), lambda i: (i, 0)),
            pl.BlockSpec((tile, d_pad), lambda i: (i, 0)),
        ),
        compiler_params=pltpu.CompilerParams(
            dimension_semantics=("parallel",)),
    )(fea_p, w_lin_t)

    # --- rounds 2..k: tiled A@u + dense + tanh --------------------------------
    round_call = pl.pallas_call(
        _round_kernel,
        out_shape=jax.ShapeDtypeStruct((n_pad, d_pad), f32),
        grid=(n_tiles, n_tiles),
        in_specs=[
            pl.BlockSpec((tile, tile), lambda i, k: (i, k)),    # adjacency tile
            pl.BlockSpec((tile, d_pad), lambda i, k: (k, 0)),   # u_prev (src rows)
            pl.BlockSpec((tile, d_pad), lambda i, k: (i, 0)),   # node_features (resident over k)
            pl.BlockSpec((d_pad, d_pad), lambda i, k: (0, 0)),  # Wd0 (resident)
            pl.BlockSpec((d_pad, d_pad), lambda i, k: (0, 0)),  # Wd1 (resident)
        ],
        out_specs=pl.BlockSpec((tile, d_pad), lambda i, k: (i, 0)),
        scratch_shapes=[pltpu.VMEM((tile, d_pad), f32)],
        compiler_params=pltpu.CompilerParams(
            dimension_semantics=("parallel", "arbitrary"),
            vmem_limit_bytes=48 << 20,  # fits v7x's 64 MiB VMEM with headroom
        ),
    )

    for _ in range(iteration_round - 1):
        u = round_call(adj_b, u, nf, w_d0_t, w_d1_t)

    return u[:n, :out_dim]


def _reference(fea, adj, w_lin, w_d0, w_d1, k=ITERATION_ROUND):
    """Pure-JAX fp32 reference of the same math."""
    node_features = fea @ w_lin.T
    u = jnp.zeros_like(node_features)
    for _ in range(k):
        m = adj @ u
        h = jnp.maximum(m @ w_d0.T, 0.0)
        h = h @ w_d1.T
        u = jnp.tanh(node_features + h)
    return u


if __name__ == "__main__":
    # Small deterministic problem: 16 nodes, in_dim=8, out_dim=32.
    num_nodes, in_dim, out_dim = 16, 8, 32

    key = jax.random.PRNGKey(0)
    k_fea, k_adj, k_lin, k_d0, k_d1 = jax.random.split(key, 5)

    fea = jax.random.normal(k_fea, (num_nodes, in_dim), dtype=jnp.float32)

    # Random directed graph as a dense 0/1 adjacency, adj[dst, src].
    adj = (jax.random.uniform(k_adj, (num_nodes, num_nodes)) < 0.3).astype(jnp.float32)

    # Deterministic parameter init (PyTorch nn.Linear weight layout: (out, in)).
    w_lin = jax.random.normal(k_lin, (out_dim, in_dim), dtype=jnp.float32) * 0.1
    w_dense0 = jax.random.normal(k_d0, (out_dim, out_dim), dtype=jnp.float32) * 0.1
    w_dense1 = jax.random.normal(k_d1, (out_dim, out_dim), dtype=jnp.float32) * 0.1

    out = structure2vec_forward(fea, adj, w_lin, w_dense0, w_dense1,
                                iteration_round=ITERATION_ROUND)
    out = jax.block_until_ready(out)

    ref = _reference(fea, adj, w_lin, w_dense0, w_dense1, k=ITERATION_ROUND)
    assert out.shape == (num_nodes, out_dim)
    # bf16 matmul operands (f32 accumulation) => loosen tolerance vs fp32 reference.
    assert jnp.allclose(out, ref, atol=2e-2, rtol=2e-2), "mismatch vs pure-JAX reference"

    print("KERNEL_OK")
</pallas_src>

<mosaic_0001>
module attributes {stable_mosaic.version = 11 : i64} {
  func.func @_init_kernel(%arg0: i32, %arg1: memref<16x8xf32, #tpu.memory_space<vmem>>, %arg2: memref<8x128xf32, #tpu.memory_space<vmem>>, %arg3: memref<16x128xf32, #tpu.memory_space<vmem>>, %arg4: memref<16x128xf32, #tpu.memory_space<vmem>>) attributes {dimension_semantics = [#tpu.dimension_semantics<parallel>], iteration_bounds = array<i64: 1>, scalar_prefetch = 0 : i64, scratch_operands = 0 : i64, tpu.core_type = #tpu.core_type<tc>, window_params = [{transform_indices = @transform_0, window_bounds = array<i64: 16, 8>}, {pipeline_mode = #tpu.pipeline_mode<synchronous>, transform_indices = @transform_1, window_bounds = array<i64: 8, 128>}, {transform_indices = @transform_2, window_bounds = array<i64: 16, 128>}, {transform_indices = @transform_3, window_bounds = array<i64: 16, 128>}]} {
    %c0 = arith.constant 0 : index
    %c0_0 = arith.constant 0 : index
    %0 = vector.load %arg1[%c0, %c0_0] : memref<16x8xf32, #tpu.memory_space<vmem>>, vector<16x8xf32>
    %c0_1 = arith.constant 0 : index
    %c0_2 = arith.constant 0 : index
    %1 = vector.load %arg2[%c0_1, %c0_2] : memref<8x128xf32, #tpu.memory_space<vmem>>, vector<8x128xf32>
    %cst = arith.constant dense<0.000000e+00> : vector<16x128xf32>
    %2 = tpu.matmul %0, %1, %cst {dimension_numbers = #tpu.dot_dimension_numbers<[1], [0], [0], [1], [0, 0, 1, 1], [], []>} : vector<16x8xf32>, vector<8x128xf32>, vector<16x128xf32> -> vector<16x128xf32>
    %c0_3 = arith.constant 0 : index
    %c0_4 = arith.constant 0 : index
    %3 = vector.load %arg3[%c0_3, %c0_4] : memref<16x128xf32, #tpu.memory_space<vmem>>, vector<16x128xf32>
    tpu.vector_store %arg3[%c0_3, %c0_4], %2 {strides = array<i32>} : memref<16x128xf32, #tpu.memory_space<vmem>>, vector<16x128xf32>,
    %4 = math.tanh %2 : vector<16x128xf32>
    %c0_5 = arith.constant 0 : index
    %c0_6 = arith.constant 0 : index
    %5 = vector.load %arg4[%c0_5, %c0_6] : memref<16x128xf32, #tpu.memory_space<vmem>>, vector<16x128xf32>
    tpu.vector_store %arg4[%c0_5, %c0_6], %4 {strides = array<i32>} : memref<16x128xf32, #tpu.memory_space<vmem>>, vector<16x128xf32>,
    return
  }
  func.func @transform_0(%arg0: i32) -> (i32, i32) {
    %c0_i32 = arith.constant 0 : i32
    %c0_i32_0 = arith.constant 0 : i32
    return %arg0, %c0_i32 : i32, i32
  }
  func.func @transform_1(%arg0: i32) -> (i32, i32) {
    %c0_i32 = arith.constant 0 : i32
    %c0_i32_0 = arith.constant 0 : i32
    %c0_i32_1 = arith.constant 0 : i32
    return %c0_i32, %c0_i32_0 : i32, i32
  }
  func.func @transform_2(%arg0: i32) -> (i32, i32) {
    %c0_i32 = arith.constant 0 : i32
    %c0_i32_0 = arith.constant 0 : i32
    return %arg0, %c0_i32 : i32, i32
  }
  func.func @transform_3(%arg0: i32) -> (i32, i32) {
    %c0_i32 = arith.constant 0 : i32
    %c0_i32_0 = arith.constant 0 : i32
    return %arg0, %c0_i32 : i32, i32
  }
}

</mosaic_0001>

<bundles_post_ra>
// kernel: tpu_custom_call.1
= control target key start
LH: loop header
LB: loop body
LE: loop exit
PB: predicated region body
PF: predicated region fallthrough
CT: control target
= control target key end

     0   :  { %9 = vsyncpa [#allocation3], 0  ;;  %vm18_vm0 = vcmask 64512   ;;  %s192_s0 = inlined_call_operand.vmem [shape: f32[16,8], index: 0, kind: input, shape index: {}]   ;;  %s193_s1 = inlined_call_operand.vmem [shape: f32[8,128], index: 1, kind: input, shape index: {}]   ;;  %s194_s2 = inlined_call_operand.hbm [shape: f32[16,128], index: 2, kind: output, shape index: {0}]   ;;  %s195_s3 = inlined_call_operand.hbm [shape: f32[16,128], index: 3, kind: output, shape index: {1}]  }
   0x1   :  { %v17_v0 = vld [vmem:[%s193_s1] sm:$0xff]  ;;  %v16_v2 = vld [vmem:[%s192_s0 + $0x8] sm:$0xff] }
   0x2   :  { %v15_v1 = vld [vmem:[%s192_s0] sm:$0xff]  ;;  %40 = vmatpush.msra.mxu0 %v17_v0  ;;  %92 = vmatpush.msra.mxu1 %v17_v0 }
   0x3   :  { %10 = vsyncpa [#allocation5], 0  ;;  %90 = vmatmul.msk.f32.vlgmr.msra.gmra.mxu0 %vm18_vm0, %v15_v1  ;;  %91 = vmatmul.msk.f32.vlgmr.msra.gmra.mxu1 %vm18_vm0, %v16_v2  ;;  %s153_s18 = smov [#allocation2]   ;;  %s60_s1 = sshll.u32 %s194_s2, 4  ;;  %s61_s1 = int_to_ptr.hbm [resolvable:$true] %s60_s1 }
   0x4   :  { %s58_s19 = sshll.u32 %s153_s18, 4  ;;  %s154_s0 = smov 128   ;;  %s59_s19 = int_to_ptr.vmem [resolvable:$true] %s58_s19 }
   0x5   :  { %s155_s22 = smov 8   ;;  %s156_s23 = smov [#allocation4]  }
   0x6   :  { %s71_s24 = sshll.u32 %s156_s23, 4  ;;  %s73_s27 = sshll.u32 %s195_s3, 4  ;;  %s72_s24 = int_to_ptr.vmem [resolvable:$true] %s71_s24  ;;  %s74_s27 = int_to_ptr.hbm [resolvable:$true] %s73_s27 }
  0x80   :  { %v42_v3 = vpop.f32.mrf.mxu0  ;;  %v45_v4 = vpop.f32.mrf.mxu1 }
  0x81   :  { %48 = vst [vmem:[#allocation2] sm:$0xff] %v42_v3  ;;  %97 = vtanh.f32 %v42_v3 }
  0x82   :  { %49 = vst [vmem:[#allocation2 + $0x8] sm:$0xff] %v45_v4  ;;  %99 = vtanh.f32 %v45_v4 }
  0x83   :  { %66 = dma.vmem_to_hbm [thread:$0]  %s59_s19, 256, %s61_s1, [#allocation3], %s154_s0, %s154_s0, %s155_s22  }
  0x87   :  { %v98_v5 = vpop.eup %97 }
  0x88   :  { %v100_v6 = vpop.eup %99  ;;  %52 = vst [vmem:[#allocation4] sm:$0xff] %v98_v5 }
  0x89   :  { %53 = vst [vmem:[#allocation4 + $0x8] sm:$0xff] %v100_v6 }
  0x8a   :  { %79 = dma.vmem_to_hbm [thread:$0]  %s72_s24, 256, %s74_s27, [#allocation5], %s154_s0, %s154_s0, %s155_s22  }
  0x8b   :  { %149 = dma.done.wait [#allocation3], 256  }
  0x8c   :  { %150 = vsyncadd [#allocation3], 4294967040 }
  0x8d   :  { %151 = dma.done.wait [#allocation5], 256  }
  0x8e   :  { %152 = vsyncadd [#allocation5], 4294967040 }
  0x8f   :  { %88 = vsyncpa [#allocation3], 1 }
  0x90   :  { %89 = vsyncpa [#allocation5], 1 }

</bundles_post_ra>
